<compile_context>
chip_gen: v7x
topology: tpu7x:2x2x1
jax: 0.10.0
libtpu: 0.0.40
codegen_flags: <defaults>
</compile_context>

<pallas_src>
import functools

import numpy as np
import jax
import jax.numpy as jnp
from jax import lax
from jax.experimental import pallas as pl
from jax.experimental.pallas import tpu as pltpu

LANE = 128
_SUBLANE = 8


def _round_up(x, m):
    return (x + m - 1) // m * m


def _cdiv(a, b):
    return -(-a // b)


# ----------------------------------------------------------------------------------------
# Kernel 1: fused 2-layer MLP forward (the SWAG base model)
# ----------------------------------------------------------------------------------------
def _mlp_kernel(x_ref, w1_ref, b1_ref, w2_ref, b2_ref, o_ref):
    # bf16 operands, f32 MXU accumulation; bias+ReLU fused on the f32 accumulator.
    h = jnp.dot(x_ref[...], w1_ref[...], preferred_element_type=jnp.float32)
    h = jnp.maximum(h + b1_ref[...], 0.0)
    y = jnp.dot(h.astype(w2_ref.dtype), w2_ref[...], preferred_element_type=jnp.float32)
    o_ref[...] = (y + b2_ref[...]).astype(o_ref.dtype)


@jax.jit
def mlp_forward(x, w1, b1, w2, b2):
    """Fused MLP forward.  w1:(H,Din), w2:(Dout,H) in torch nn.Linear layout."""
    b, d_in = x.shape
    hidden = w1.shape[0]
    d_out = w2.shape[0]

    # Lane-dense padding (multiple of 128) for hidden and output columns: output stores are
    # unmasked vst and the MXU result columns are fully used.  Zero padding is exact.
    hidden_p = _round_up(hidden, LANE)
    d_out_p = _round_up(d_out, LANE)

    w1t = jnp.zeros((d_in, hidden_p), jnp.bfloat16).at[:, :hidden].set(w1.T.astype(jnp.bfloat16))
    b1r = jnp.zeros((1, hidden_p), jnp.float32).at[:, :hidden].set(b1.astype(jnp.float32))
    w2t = jnp.zeros((hidden_p, d_out_p), jnp.bfloat16).at[:hidden, :d_out].set(
        w2.T.astype(jnp.bfloat16))
    b2r = jnp.zeros((1, d_out_p), jnp.float32).at[:, :d_out].set(b2.astype(jnp.float32))

    # Pad the batch to a multiple of 8 (no giant single-block fallback) and pick the largest
    # batch tile <= 256 that divides it (fills the 256-row MXU on v6e/v7x when possible).
    b_pad = _round_up(b, _SUBLANE)
    tb = next(t for t in (256, 128, 64, 32, 16, 8) if b_pad % t == 0)
    xp = jnp.zeros((b_pad, d_in), jnp.bfloat16).at[:b].set(x.astype(jnp.bfloat16))
    grid = (b_pad // tb,)

    cost = pl.CostEstimate(
        flops=2 * b_pad * (d_in * hidden_p + hidden_p * d_out_p),
        transcendentals=0,
        bytes_accessed=2 * (b_pad * d_in + d_in * hidden_p + hidden_p * d_out_p)
        + 4 * (hidden_p + d_out_p + b_pad * d_out_p),
    )
    out = pl.pallas_call(
        _mlp_kernel,
        out_shape=jax.ShapeDtypeStruct((b_pad, d_out_p), jnp.float32),
        grid=grid,
        in_specs=[
            pl.BlockSpec((tb, d_in), lambda i: (i, 0)),
            # Weights / biases: same block every step -> DMA'd once, resident in VMEM.
            pl.BlockSpec((d_in, hidden_p), lambda i: (0, 0)),
            pl.BlockSpec((1, hidden_p), lambda i: (0, 0)),
            pl.BlockSpec((hidden_p, d_out_p), lambda i: (0, 0)),
            pl.BlockSpec((1, d_out_p), lambda i: (0, 0)),
        ],
        out_specs=pl.BlockSpec((tb, d_out_p), lambda i: (i, 0)),
        compiler_params=pltpu.CompilerParams(dimension_semantics=("parallel",)),
        cost_estimate=cost,
    )(xp, w1t, b1r, w2t, b2r)
    return out[:b, :d_out].astype(x.dtype)


# ----------------------------------------------------------------------------------------
# Kernel 2: SWAG sample over a lane/sublane-dense [rows, 128] slab of the parameter vector
# ----------------------------------------------------------------------------------------
def _swag_sample_kernel_full(sc_ref, eps_ref, mean_ref, sqm_ref, nz_ref, cov_ref, out_ref):
    mean = mean_ref[...]                                # (tile, 128) f32
    sqrt_scale = sc_ref[0]                              # hoisted sqrt(scale), from SMEM
    var_clamp = sc_ref[1]
    k_rank = cov_ref.shape[0]

    # Low-rank term cov_factor.T @ eps_lr as an unrolled VPU broadcast-FMA over rank K.
    # cov_factor streams as bf16 (dominant HBM stream); the accumulator stays f32 in vregs.
    def _fma(k, acc):
        return acc + eps_ref[k] * cov_ref[k].astype(jnp.float32)

    z = lax.fori_loop(0, k_rank, _fma, jnp.zeros(mean.shape, jnp.float32), unroll=True)

    # variance = clamp(sq_mean - mean^2, var_clamp), computed in-kernel (f32 throughout).
    var = jnp.maximum(sqm_ref[...] - mean * mean, var_clamp)
    # NOTE: the reference module adds `variance * eps` (NOT sqrt(variance) * eps);
    #       we keep the reference semantics exactly.
    z = z + var * nz_ref[...].astype(jnp.float32)
    out_ref[...] = mean + sqrt_scale * z


def _swag_sample_kernel_lowrank(sc_ref, eps_ref, mean_ref, cov_ref, out_ref):
    mean = mean_ref[...]
    sqrt_scale = sc_ref[0]
    k_rank = cov_ref.shape[0]

    def _fma(k, acc):
        return acc + eps_ref[k] * cov_ref[k].astype(jnp.float32)

    z = lax.fori_loop(0, k_rank, _fma, jnp.zeros(mean.shape, jnp.float32), unroll=True)
    out_ref[...] = mean + sqrt_scale * z


def _slab_geometry(p, k_rank, diag_noise, max_tile_rows):
    """Balanced [rows,128] tiling + VMEM budget derived from K / dtypes (v7x-safe)."""
    rows = _cdiv(p, LANE)
    # Bytes per slab row (128 lanes): mean f32 + out f32 + cov bf16*K
    #                                 (+ sq_mean f32 + diag-noise bf16 when diag_noise).
    bytes_per_row = LANE * (4 + 4 + 2 * k_rank + ((4 + 2) if diag_noise else 0))
    budget = 40 * 1024 * 1024                  # double-buffered working-set cap (< v7x 64 MiB)
    tile_cap = max(_SUBLANE, (budget // (2 * bytes_per_row)) // _SUBLANE * _SUBLANE)
    max_tile = max(_SUBLANE, min(int(max_tile_rows), tile_cap))
    n_tiles = max(1, _cdiv(rows, max_tile))
    # Balanced tiles: padding waste is <= 8*n_tiles rows, not up to (tile-1) rows.
    tile = _round_up(_cdiv(rows, n_tiles), _SUBLANE)
    rows_pad = n_tiles * tile
    vmem_limit = 2 * tile * bytes_per_row + (4 << 20)   # double-buffered streams + slack
    return rows_pad, tile, n_tiles, int(vmem_limit)


def _pad_to_slab(v, rows_pad):
    p = v.shape[-1]
    pad = rows_pad * LANE - p
    v = jnp.pad(v, [(0, 0)] * (v.ndim - 1) + [(0, pad)])
    return v.reshape(v.shape[:-1] + (rows_pad, LANE))


@functools.partial(jax.jit, static_argnames=("diag_noise", "max_tile_rows"))
def swag_sample(mean, sq_mean, cov_factor, eps_low_rank, scale, var_clamp,
                eps_diag=None, diag_noise=True, max_tile_rows=1024):
    """sample = mean + sqrt(scale) * (cov_factor.T @ eps_lr [+ variance * eps_diag])."""
    if diag_noise and eps_diag is None:
        raise ValueError("diag_noise=True requires eps_diag")
    p = mean.shape[0]
    k = cov_factor.shape[0]
    rows_pad, tile, n_tiles, vmem_limit = _slab_geometry(p, k, diag_noise, max_tile_rows)

    mean_s = _pad_to_slab(mean.astype(jnp.float32), rows_pad)            # (rows_pad, 128) f32
    cov_s = _pad_to_slab(cov_factor.astype(jnp.bfloat16), rows_pad)      # (K, rows_pad, 128) bf16

    # Scalars go to SMEM (no broadcast [P] constant streams); sqrt(scale) hoisted here.
    scalars = jnp.stack([jnp.sqrt(jnp.asarray(scale, jnp.float32)),
                         jnp.asarray(var_clamp, jnp.float32)])
    eps = eps_low_rank.astype(jnp.float32)

    slab_spec = pl.BlockSpec((tile, LANE), lambda i: (i, 0))
    cov_spec = pl.BlockSpec((k, tile, LANE), lambda i: (0, i, 0))
    smem_spec = pl.BlockSpec(memory_space=pltpu.MemorySpace.SMEM)

    if diag_noise:
        sqm_s = _pad_to_slab(sq_mean.astype(jnp.float32), rows_pad)
        nz_s = _pad_to_slab(eps_diag.astype(jnp.bfloat16), rows_pad)     # bf16 noise stream
        kernel = _swag_sample_kernel_full
        in_specs = [smem_spec, smem_spec, slab_spec, slab_spec, slab_spec, cov_spec]
        args = (scalars, eps, mean_s, sqm_s, nz_s, cov_s)
    else:
        # No sq_mean / noise inputs at all on the no-noise path -> no wasted DMA.
        kernel = _swag_sample_kernel_lowrank
        in_specs = [smem_spec, smem_spec, slab_spec, cov_spec]
        args = (scalars, eps, mean_s, cov_s)

    cost = pl.CostEstimate(
        flops=(2 * k + (6 if diag_noise else 2)) * rows_pad * LANE,
        transcendentals=0,
        bytes_accessed=rows_pad * LANE * (8 + 2 * k + (6 if diag_noise else 0)),
    )
    out = pl.pallas_call(
        kernel,
        out_shape=jax.ShapeDtypeStruct((rows_pad, LANE), jnp.float32),
        grid=(n_tiles,),
        in_specs=in_specs,
        out_specs=pl.BlockSpec((tile, LANE), lambda i: (i, 0)),
        compiler_params=pltpu.CompilerParams(
            dimension_semantics=("parallel",),          # v7x can shard P-tiles over its 2 TCs
            vmem_limit_bytes=vmem_limit,                # derived from K/tile, not hard-coded
        ),
        cost_estimate=cost,
    )(*args)
    return out.reshape(-1)[:p]


# ----------------------------------------------------------------------------------------
# Host-side SWAG bookkeeping (mirrors the torch flatten/set_weights/collect_model code)
# ----------------------------------------------------------------------------------------
def flatten_params(params):
    return jnp.concatenate([jnp.ravel(p) for p in params])


def unflatten_params(vector, shapes):
    out, off = [], 0
    for s in shapes:
        n = int(np.prod(s))
        out.append(vector[off:off + n].reshape(s))
        off += n
    return out


class SwagMLP:
    """JAX/Pallas port of SWAG wrapping a 2-layer MLP base model (Linear -> ReLU -> Linear)."""

    # TODO(synk): _load_from_state_dict / .cuda()/.to() device plumbing has no Pallas
    #             equivalent; state lives as plain JAX/NumPy attributes here.

    def __init__(self, params, var_clamp=1e-6, max_rank=20):
        # params: [W1 (H,Din), b1 (H,), W2 (Dout,H), b2 (Dout,)]  in torch nn.Linear layout.
        self.params = [jnp.asarray(p, jnp.float32) for p in params]
        self.param_shapes = [tuple(p.shape) for p in self.params]
        self.num_parameters = sum(int(np.prod(s)) for s in self.param_shapes)
        self.var_clamp = float(var_clamp)
        self.max_rank = int(max_rank)
        self.mean = jnp.zeros((self.num_parameters,), jnp.float32)
        self.sq_mean = jnp.zeros((self.num_parameters,), jnp.float32)
        self.n_models = 0
        self.cov_mat_sqrt = np.zeros((0, self.num_parameters), np.float32)
        self.cov_factor = None

    # --- forward(): SWAG just dispatches to the base model (fused Pallas MLP kernel) ---
    def forward(self, x):
        w1, b1, w2, b2 = self.params
        return mlp_forward(x, w1, b1, w2, b2)

    __call__ = forward

    # --- statistics collection (host-side, mirrors the torch .item()/in-place code) ---
    def collect_model(self, params):
        self.cov_factor = None
        w = flatten_params(params)
        n = float(self.n_models)
        self.mean = self.mean * (n / (n + 1.0)) + w / (n + 1.0)
        self.sq_mean = self.sq_mean * (n / (n + 1.0)) + (w ** 2) / (n + 1.0)
        dev = np.asarray(w - self.mean, np.float32)
        if self.cov_mat_sqrt.shape[0] + 1 > self.max_rank:
            self.cov_mat_sqrt = self.cov_mat_sqrt[1:]
        self.cov_mat_sqrt = np.concatenate([self.cov_mat_sqrt, dev[None, :]], axis=0)
        self.n_models += 1

    def fit(self):
        if self.cov_factor is None:
            k = self.cov_mat_sqrt.shape[0]
            norm = float(np.sqrt(max(k - 1, 1)))
            self.cov_factor = jnp.asarray(self.cov_mat_sqrt / norm, jnp.float32)

    def _get_mean_and_variance(self):
        variance = jnp.maximum(self.sq_mean - self.mean ** 2, self.var_clamp)
        return self.mean, variance

    def get_space(self, export_cov_factor=True):
        mean, variance = self._get_mean_and_variance()
        if not export_cov_factor:
            return mean, variance
        self.fit()
        return mean, variance, self.cov_factor

    def set_swa(self):
        self.params = unflatten_params(self.mean, self.param_shapes)

    def sample(self, key, scale=0.5, diag_noise=True, eps_low_rank=None):
        self.fit()
        k = self.cov_factor.shape[0]
        key_lr, key_diag = jax.random.split(key)
        if eps_low_rank is None:
            eps_low_rank = jax.random.normal(key_lr, (k,), jnp.float32)
        # Exact torch.randn_like semantics: standard-normal diag noise from jax.random.
        eps_diag = (jax.random.normal(key_diag, (self.num_parameters,), jnp.float32)
                    if diag_noise else None)
        sample_vec = swag_sample(self.mean, self.sq_mean, self.cov_factor,
                                 eps_low_rank, scale, self.var_clamp,
                                 eps_diag=eps_diag, diag_noise=diag_noise)
        # set_weights(): load the sampled flat vector back into the base model parameters.
        self.params = unflatten_params(sample_vec, self.param_shapes)
        return sample_vec


# ----------------------------------------------------------------------------------------
# Demo / self-check
# ----------------------------------------------------------------------------------------
if __name__ == "__main__":
    key = jax.random.PRNGKey(0)
    k_w1, k_b1, k_w2, k_b2, k_x, k_collect, k_s1, k_s2 = jax.random.split(key, 8)

    batch, d_in, hidden, d_out = 128, 16, 32, 8
    w1 = 0.2 * jax.random.normal(k_w1, (hidden, d_in), jnp.float32)
    b1 = 0.1 * jax.random.normal(k_b1, (hidden,), jnp.float32)
    w2 = 0.2 * jax.random.normal(k_w2, (d_out, hidden), jnp.float32)
    b2 = 0.1 * jax.random.normal(k_b2, (d_out,), jnp.float32)
    x = jax.random.normal(k_x, (batch, d_in), jnp.float32)

    swag = SwagMLP([w1, b1, w2, b2], var_clamp=1e-6, max_rank=20)

    # 1) forward() == base-model forward, via the fused Pallas MLP kernel (bf16 MXU path).
    y = jax.block_until_ready(swag(x))
    y_ref = jnp.maximum(x @ w1.T + b1, 0.0) @ w2.T + b2
    np.testing.assert_allclose(np.asarray(y), np.asarray(y_ref), rtol=5e-2, atol=5e-2)

    # 2) collect a few "checkpoints" (perturbed parameter sets), as SWAG does during SWA.
    for ck in jax.random.split(k_collect, 6):
        pk = jax.random.split(ck, 4)
        perturbed = [p + 0.05 * jax.random.normal(kk, p.shape, jnp.float32)
                     for p, kk in zip([w1, b1, w2, b2], pk)]
        swag.collect_model(perturbed)

    # 3) sample without diag noise is deterministic given eps_lr -> check against pure JAX.
    #    cov_factor is streamed in bf16, so the tight reference uses bf16-quantized cov.
    swag.fit()
    k_rank = swag.cov_factor.shape[0]
    eps_lr = jax.random.normal(k_s1, (k_rank,), jnp.float32)
    s_lowrank = jax.block_until_ready(
        swag.sample(k_s1, scale=0.5, diag_noise=False, eps_low_rank=eps_lr))
    cov_q = swag.cov_factor.astype(jnp.bfloat16).astype(jnp.float32)
    s_ref_q = swag.mean + np.sqrt(0.5) * jnp.sum(cov_q * eps_lr[:, None], axis=0)
    np.testing.assert_allclose(np.asarray(s_lowrank), np.asarray(s_ref_q),
                               rtol=1e-4, atol=1e-4)
    s_ref_f32 = swag.mean + np.sqrt(0.5) * jnp.sum(swag.cov_factor * eps_lr[:, None], axis=0)
    np.testing.assert_allclose(np.asarray(s_lowrank), np.asarray(s_ref_f32),
                               rtol=1e-2, atol=1e-2)

    # 4) full SWAG sample (low-rank + diagonal Gaussian noise), then forward with it.
    s_full = jax.block_until_ready(swag.sample(k_s2, scale=0.5, diag_noise=True))
    assert s_full.shape == (swag.num_parameters,)
    assert bool(jnp.all(jnp.isfinite(s_full)))
    assert float(jnp.max(jnp.abs(s_full - s_lowrank))) > 0.0
    y_sampled = jax.block_until_ready(swag(x))
    assert y_sampled.shape == (batch, d_out)
    assert bool(jnp.all(jnp.isfinite(y_sampled)))

    print("KERNEL_OK")
</pallas_src>

<mosaic_0001>
module attributes {stable_mosaic.version = 11 : i64} {
  func.func @_mlp_kernel(%arg0: i32, %arg1: memref<128x16xbf16, #tpu.memory_space<vmem>>, %arg2: memref<16x128xbf16, #tpu.memory_space<vmem>>, %arg3: memref<1x128xf32, #tpu.memory_space<vmem>>, %arg4: memref<128x128xbf16, #tpu.memory_space<vmem>>, %arg5: memref<1x128xf32, #tpu.memory_space<vmem>>, %arg6: memref<128x128xf32, #tpu.memory_space<vmem>>) attributes {dimension_semantics = [#tpu.dimension_semantics<parallel>], iteration_bounds = array<i64: 1>, scalar_prefetch = 0 : i64, scratch_operands = 0 : i64, tpu.core_type = #tpu.core_type<tc>, window_params = [{transform_indices = @transform_0, window_bounds = array<i64: 128, 16>}, {pipeline_mode = #tpu.pipeline_mode<synchronous>, transform_indices = @transform_1, window_bounds = array<i64: 16, 128>}, {pipeline_mode = #tpu.pipeline_mode<synchronous>, transform_indices = @transform_2, window_bounds = array<i64: 1, 128>}, {pipeline_mode = #tpu.pipeline_mode<synchronous>, transform_indices = @transform_3, window_bounds = array<i64: 128, 128>}, {pipeline_mode = #tpu.pipeline_mode<synchronous>, transform_indices = @transform_4, window_bounds = array<i64: 1, 128>}, {transform_indices = @transform_5, window_bounds = array<i64: 128, 128>}]} {
    %c0 = arith.constant 0 : index
    %c0_0 = arith.constant 0 : index
    %0 = vector.load %arg1[%c0, %c0_0] : memref<128x16xbf16, #tpu.memory_space<vmem>>, vector<128x16xbf16>
    %c0_1 = arith.constant 0 : index
    %c0_2 = arith.constant 0 : index
    %1 = vector.load %arg2[%c0_1, %c0_2] : memref<16x128xbf16, #tpu.memory_space<vmem>>, vector<16x128xbf16>
    %cst = arith.constant dense<0.000000e+00> : vector<128x128xf32>
    %2 = tpu.matmul %0, %1, %cst {dimension_numbers = #tpu.dot_dimension_numbers<[1], [0], [0], [1], [0, 0, 1, 1], [], []>} : vector<128x16xbf16>, vector<16x128xbf16>, vector<128x128xf32> -> vector<128x128xf32>
    %c0_3 = arith.constant 0 : index
    %c0_4 = arith.constant 0 : index
    %3 = vector.load %arg3[%c0_3, %c0_4] : memref<1x128xf32, #tpu.memory_space<vmem>>, vector<1x128xf32>
    %4 = vector.broadcast %3 : vector<1x128xf32> to vector<128x128xf32>
    %5 = arith.addf %2, %4 : vector<128x128xf32>
    %cst_5 = arith.constant 0.000000e+00 : f32
    %6 = vector.broadcast %cst_5 : f32 to vector<128x128xf32>
    %7 = arith.maximumf %5, %6 : vector<128x128xf32>
    %8 = arith.truncf %7 : vector<128x128xf32> to vector<128x128xbf16>
    %c0_6 = arith.constant 0 : index
    %c0_7 = arith.constant 0 : index
    %9 = vector.load %arg4[%c0_6, %c0_7] : memref<128x128xbf16, #tpu.memory_space<vmem>>, vector<128x128xbf16>
    %cst_8 = arith.constant dense<0.000000e+00> : vector<128x128xf32>
    %10 = tpu.matmul %8, %9, %cst_8 {dimension_numbers = #tpu.dot_dimension_numbers<[1], [0], [0], [1], [0, 0, 1, 1], [], []>} : vector<128x128xbf16>, vector<128x128xbf16>, vector<128x128xf32> -> vector<128x128xf32>
    %c0_9 = arith.constant 0 : index
    %c0_10 = arith.constant 0 : index
    %11 = vector.load %arg5[%c0_9, %c0_10] : memref<1x128xf32, #tpu.memory_space<vmem>>, vector<1x128xf32>
    %12 = vector.broadcast %11 : vector<1x128xf32> to vector<128x128xf32>
    %13 = arith.addf %10, %12 : vector<128x128xf32>
    %c0_11 = arith.constant 0 : index
    %c0_12 = arith.constant 0 : index
    %14 = vector.load %arg6[%c0_11, %c0_12] : memref<128x128xf32, #tpu.memory_space<vmem>>, vector<128x128xf32>
    tpu.vector_store %arg6[%c0_11, %c0_12], %13 {strides = array<i32>} : memref<128x128xf32, #tpu.memory_space<vmem>>, vector<128x128xf32>,
    return
  }
  func.func @transform_0(%arg0: i32) -> (i32, i32) {
    %c0_i32 = arith.constant 0 : i32
    %c0_i32_0 = arith.constant 0 : i32
    return %arg0, %c0_i32 : i32, i32
  }
  func.func @transform_1(%arg0: i32) -> (i32, i32) {
    %c0_i32 = arith.constant 0 : i32
    %c0_i32_0 = arith.constant 0 : i32
    %c0_i32_1 = arith.constant 0 : i32
    return %c0_i32, %c0_i32_0 : i32, i32
  }
  func.func @transform_2(%arg0: i32) -> (i32, i32) {
    %c0_i32 = arith.constant 0 : i32
    %c0_i32_0 = arith.constant 0 : i32
    %c0_i32_1 = arith.constant 0 : i32
    return %c0_i32, %c0_i32_0 : i32, i32
  }
  func.func @transform_3(%arg0: i32) -> (i32, i32) {
    %c0_i32 = arith.constant 0 : i32
    %c0_i32_0 = arith.constant 0 : i32
    %c0_i32_1 = arith.constant 0 : i32
    return %c0_i32, %c0_i32_0 : i32, i32
  }
  func.func @transform_4(%arg0: i32) -> (i32, i32) {
    %c0_i32 = arith.constant 0 : i32
    %c0_i32_0 = arith.constant 0 : i32
    %c0_i32_1 = arith.constant 0 : i32
    return %c0_i32, %c0_i32_0 : i32, i32
  }
  func.func @transform_5(%arg0: i32) -> (i32, i32) {
    %c0_i32 = arith.constant 0 : i32
    %c0_i32_0 = arith.constant 0 : i32
    return %arg0, %c0_i32 : i32, i32
  }
}

</mosaic_0001>

<bundles_post_ra>
// kernel: mlp_forward.1
= control target key start
LH: loop header
LB: loop body
LE: loop exit
PB: predicated region body
PF: predicated region fallthrough
CT: control target
= control target key end

     0   :  { %vm92_vm0 = vcmask 130048   ;;  %s704_s1 = inlined_call_operand.vmem [shape: bf16[16,128], index: 1, kind: input, shape index: {}]   ;;  %s705_s0 = inlined_call_operand.vmem [shape: bf16[128,16], index: 0, kind: input, shape index: {}]   ;;  %s706_s3 = inlined_call_operand.vmem [shape: bf16[128,128], index: 3, kind: input, shape index: {}]   ;;  %s707_s2 = inlined_call_operand.vmem [shape: f32[1,128], index: 2, kind: input, shape index: {}]   ;;  %s708_s4 = inlined_call_operand.vmem [shape: f32[1,128], index: 4, kind: input, shape index: {}]   ;;  %s709_s5 = inlined_call_operand.vmem [shape: f32[128,128], index: 5, kind: output, shape index: {}]  }
   0x1   :  { %v544_v0 = vld [vmem:[%s704_s1] sm:$0xff]   ;;  %v546_v2 = vld [vmem:[%s705_s0 + $0x8] sm:$0xff]   ;;  %v547_v3 = vld [vmem:[%s705_s0 + $0x10] sm:$0xff]  }
   0x2   :  { %v545_v1 = vld [vmem:[%s705_s0] sm:$0xff]   ;;  %478 = vmatprep.subr.bf16.mxu0 %v544_v0  ;;  %v548_v4 = vld [vmem:[%s705_s0 + $0x18] sm:$0xff]   ;;  %v554_v6 = vld [vmem:[%s706_s3 + $0x8] sm:$0xff]  }
   0x3   :  { %479 = vmatpush3.bf16.msra.mxu0 %v544_v0  ;;  %480 = vmatprep.mubr.msk.bf16.mxu0 %vm92_vm0, %v545_v1  ;;  %v553_v5 = vld [vmem:[%s706_s3] sm:$0xff]   ;;  %v555_v8 = vld [vmem:[%s706_s3 + $0x10] sm:$0xff]   ;;  %v556_v9 = vld [vmem:[%s706_s3 + $0x18] sm:$0xff]  }
   0x4   :  { %v549_v7 = vld [vmem:[%s705_s0 + $0x20] sm:$0xff]   ;;  %496 = vmatprep.subr.bf16.mxu0 %v553_v5  ;;  %528 = vmatprep.subr.bf16.mxu1 %v553_v5  ;;  %v550_v10 = vld [vmem:[%s705_s0 + $0x28] sm:$0xff]   ;;  %v551_v11 = vld [vmem:[%s705_s0 + $0x30] sm:$0xff]  }
   0x5   :  { %536 = vmatpush3.bf16.msra.mxu1 %v553_v5  ;;  %v557_v12 = vld [vmem:[%s706_s3 + $0x20] sm:$0xff]   ;;  %v558_v13 = vld [vmem:[%s706_s3 + $0x28] sm:$0xff]   ;;  %v552_v14 = vld [vmem:[%s705_s0 + $0x38] sm:$0xff]  }
   0x6   :  { %481 = vmatmul.mubr.msk.bf16.vlgmr.msra.gmra.mrb[0].mxu0 %vm92_vm0, %v546_v2  ;;  %529 = vmatprep.subr.bf16.mxu1 %v554_v6  ;;  %v559_v15 = vld [vmem:[%s706_s3 + $0x30] sm:$0xff]   ;;  %v560_v16 = vld [vmem:[%s706_s3 + $0x38] sm:$0xff]   ;;  %v426_v17 = vld [vmem:[%s707_s2] ss:$0 sm:$0xff] }
   0x7   :  { %484 = vmatprep.mubr.msk.bf16.mxu0 %vm92_vm0, %v547_v3  ;;  %497 = vmatpush3.bf16.msra.mxu0 %v553_v5 }
   0x8   :  { %498 = vmatprep.subr.bf16.mxu0 %v554_v6 }
   0x9   :  { %537 = vmatpush3.bf16.msra.mxu1 %v554_v6 }
   0xa   :  { %530 = vmatprep.subr.bf16.mxu1 %v555_v8 }
   0xb   :  { %499 = vmatpush3.bf16.msra.mxu0 %v554_v6 }
   0xc   :  { %500 = vmatprep.subr.bf16.mxu0 %v555_v8 }
   0xd   :  { %538 = vmatpush3.bf16.msra.mxu1 %v555_v8 }
   0xe   :  { %485 = vmatmul.mubr.msk.bf16.gmra.mrb[4].mxu0 %vm92_vm0, %v548_v4  ;;  %531 = vmatprep.subr.bf16.mxu1 %v556_v9 }
   0xf   :  { %488 = vmatprep.mubr.msk.bf16.mxu0 %vm92_vm0, %v549_v7  ;;  %501 = vmatpush3.bf16.msra.mxu0 %v555_v8 }
  0x10   :  { %502 = vmatprep.subr.bf16.mxu0 %v556_v9 }
  0x11   :  { %539 = vmatpush3.bf16.msra.mxu1 %v556_v9 }
  0x12   :  { %532 = vmatprep.subr.bf16.mxu1 %v557_v12 }
  0x13   :  { %503 = vmatpush3.bf16.msra.mxu0 %v556_v9 }
  0x14   :  { %504 = vmatprep.subr.bf16.mxu0 %v557_v12 }
  0x15   :  { %540 = vmatpush3.bf16.msra.mxu1 %v557_v12 }
  0x16   :  { %489 = vmatmul.mubr.msk.bf16.gmra.mrb[8].mxu0 %vm92_vm0, %v550_v10  ;;  %533 = vmatprep.subr.bf16.mxu1 %v558_v13  ;;  %v444_v10 = vld [vmem:[%s708_s4] ss:$0 sm:$0xff] }
  0x17   :  { %492 = vmatprep.mubr.msk.bf16.mxu0 %vm92_vm0, %v551_v11  ;;  %505 = vmatpush3.bf16.msra.mxu0 %v557_v12 }
  0x18   :  { %506 = vmatprep.subr.bf16.mxu0 %v558_v13 }
  0x19   :  { %541 = vmatpush3.bf16.msra.mxu1 %v558_v13 }
  0x1a   :  { %534 = vmatprep.subr.bf16.mxu1 %v559_v15 }
  0x1b   :  { %507 = vmatpush3.bf16.msra.mxu0 %v558_v13 }
  0x1c   :  { %508 = vmatprep.subr.bf16.mxu0 %v559_v15 }
  0x1d   :  { %542 = vmatpush3.bf16.msra.mxu1 %v559_v15 }
  0x1e   :  { %493 = vmatmul.mubr.msk.bf16.gmra.mrb[12].mxu0 %vm92_vm0, %v552_v14  ;;  %535 = vmatprep.subr.bf16.mxu1 %v560_v16 }
  0x1f   :  { %509 = vmatpush3.bf16.msra.mxu0 %v559_v15 }
  0x20   :  { %510 = vmatprep.subr.bf16.mxu0 %v560_v16 }
  0x21   :  { %543 = vmatpush3.bf16.msra.mxu1 %v560_v16 }
  0x23   :  { %511 = vmatpush3.bf16.msra.mxu0 %v560_v16 }
  0xd9   :  { %v482_v18 = vpop.f32.mrb[0].mxu0 }
  0xda   :  { %v160_v19 = vadd.f32 %v482_v18, %v426_v17  ;;  %v151_v20 = vpop.f32.mrb[1].mxu0 }
  0xdb   :  { %v152_v21 = vadd.f32 %v426_v17, %v151_v20  ;;  %v483_v22 = vpop.f32.mrb[2].mxu0 }
  0xdc   :  { %v163_v23 = vadd.f32 %v483_v22, %v426_v17  ;;  %v154_v24 = vpop.f32.mrb[3].mxu0  ;;  %v216_v26 = vmax.f32 %v160_v19, 0.0 }
  0xdd   :  { %v155_v25 = vadd.f32 %v426_v17, %v154_v24  ;;  %v214_v28 = vmax.f32 %v152_v21, 0.0 }
  0xde   :  { %v217_v27 = vmax.f32 %v163_v23, 0.0 }
  0xdf   :  { %v215_v29 = vmax.f32 %v155_v25, 0.0 }
  0xe0   :  { %v231_v30 = vpack.c.bf16 %v217_v27, %v216_v26 }
  0xe1   :  { %v230_v31 = vpack.c.bf16 %v215_v29, %v214_v28  ;;  %v486_v32 = vpop.f32.mrb[4].mxu0 }
  0xe2   :  { %v176_v33 = vadd.f32 %v486_v32, %v426_v17  ;;  %v167_v34 = vpop.f32.mrb[5].mxu0 }
  0xe3   :  { %v168_v35 = vadd.f32 %v426_v17, %v167_v34  ;;  %v487_v36 = vpop.f32.mrb[6].mxu0  ;;  %512 = vmatprep.mubr.bf16.mxu0 %v230_v31 }
  0xe4   :  { %v179_v37 = vadd.f32 %v487_v36, %v426_v17  ;;  %v170_v38 = vpop.f32.mrb[7].mxu0  ;;  %513 = vmatmul.mubr.bf16.vlgmr.msra.gmra.mrb[16].mxu0 %v231_v30  ;;  %v220_v40 = vmax.f32 %v176_v33, 0.0 }
  0xe5   :  { %v171_v39 = vadd.f32 %v426_v17, %v170_v38  ;;  %v218_v42 = vmax.f32 %v168_v35, 0.0 }
  0xe6   :  { %v221_v41 = vmax.f32 %v179_v37, 0.0 }
  0xe7   :  { %v219_v43 = vmax.f32 %v171_v39, 0.0 }
  0xe8   :  { %v233_v44 = vpack.c.bf16 %v221_v41, %v220_v40 }
  0xe9   :  { %v490_v45 = vpop.f32.mrb[8].mxu0  ;;  %v232_v46 = vpack.c.bf16 %v219_v43, %v218_v42 }
  0xea   :  { %v192_v47 = vadd.f32 %v490_v45, %v426_v17  ;;  %v183_v48 = vpop.f32.mrb[9].mxu0 }
  0xeb   :  { %v184_v49 = vadd.f32 %v426_v17, %v183_v48  ;;  %v491_v50 = vpop.f32.mrb[10].mxu0  ;;  %516 = vmatprep.mubr.bf16.mxu1 %v232_v46 }
  0xec   :  { %v195_v51 = vadd.f32 %v491_v50, %v426_v17  ;;  %v186_v52 = vpop.f32.mrb[11].mxu0  ;;  %517 = vmatmul.mubr.bf16.vlgmr.msra.gmra.mrb[0].mxu1 %v233_v44  ;;  %v224_v54 = vmax.f32 %v192_v47, 0.0 }
  0xed   :  { %v187_v53 = vadd.f32 %v426_v17, %v186_v52  ;;  %v222_v56 = vmax.f32 %v184_v49, 0.0 }
  0xee   :  { %v225_v55 = vmax.f32 %v195_v51, 0.0 }
  0xef   :  { %v223_v57 = vmax.f32 %v187_v53, 0.0 }
  0xf0   :  { %v235_v58 = vpack.c.bf16 %v225_v55, %v224_v54 }
  0xf1   :  { %v234_v59 = vpack.c.bf16 %v223_v57, %v222_v56  ;;  %v494_v60 = vpop.f32.mrb[12].mxu0 }
  0xf2   :  { %v208_v61 = vadd.f32 %v494_v60, %v426_v17  ;;  %v199_v62 = vpop.f32.mrb[13].mxu0 }
  0xf3   :  { %v200_v63 = vadd.f32 %v426_v17, %v199_v62  ;;  %v495_v0 = vpop.f32.mrb[14].mxu0  ;;  %520 = vmatprep.mubr.bf16.mxu1 %v234_v59 }
  0xf4   :  { %v211_v1 = vadd.f32 %v495_v0, %v426_v17  ;;  %v202_v2 = vpop.f32.mrb[15].mxu0  ;;  %521 = vmatmul.mubr.bf16.gmra.mrb[4].mxu1 %v235_v58  ;;  %v228_v4 = vmax.f32 %v208_v61, 0.0 }
  0xf5   :  { %v203_v3 = vadd.f32 %v426_v17, %v202_v2  ;;  %v226_v6 = vmax.f32 %v200_v63, 0.0 }
  0xf6   :  { %v229_v5 = vmax.f32 %v211_v1, 0.0 }
  0xf7   :  { %v227_v7 = vmax.f32 %v203_v3, 0.0 }
  0xf8   :  { %v237_v8 = vpack.c.bf16 %v229_v5, %v228_v4 }
  0xf9   :  { %v236_v9 = vpack.c.bf16 %v227_v7, %v226_v6 }
  0xfb   :  { %524 = vmatprep.mubr.bf16.mxu1 %v236_v9 }
  0xfc   :  { %525 = vmatmul.mubr.bf16.gmra.mrb[8].mxu1 %v237_v8 }
 0x1b7   :  { %v514_v11 = vpop.f32.mrb[16].mxu0 }
 0x1b8   :  { %v352_v12 = vadd.f32 %v514_v11, %v444_v10  ;;  %v343_v13 = vpop.f32.mrb[17].mxu0 }
 0x1b9   :  { %v344_v14 = vadd.f32 %v444_v10, %v343_v13  ;;  %v515_v15 = vpop.f32.mrb[18].mxu0 }
 0x1ba   :  { %408 = vst [vmem:[%s709_s5 + $0x10] sm:$0xff] %v352_v12  ;;  %v355_v16 = vadd.f32 %v515_v15, %v444_v10  ;;  %v346_v17 = vpop.f32.mrb[19].mxu0 }
 0x1bb   :  { %406 = vst [vmem:[%s709_s5] sm:$0xff] %v344_v14  ;;  %v347_v18 = vadd.f32 %v444_v10, %v346_v17 }
 0x1bc   :  { %409 = vst [vmem:[%s709_s5 + $0x18] sm:$0xff] %v355_v16 }
 0x1bd   :  { %407 = vst [vmem:[%s709_s5 + $0x8] sm:$0xff] %v347_v18 }
 0x1bf   :  { %v518_v19 = vpop.f32.mrb[0].mxu1 }
 0x1c0   :  { %v368_v20 = vadd.f32 %v518_v19, %v444_v10  ;;  %v359_v21 = vpop.f32.mrb[1].mxu1 }
 0x1c1   :  { %v360_v22 = vadd.f32 %v444_v10, %v359_v21  ;;  %v519_v23 = vpop.f32.mrb[2].mxu1 }
 0x1c2   :  { %412 = vst [vmem:[%s709_s5 + $0x30] sm:$0xff] %v368_v20  ;;  %v371_v24 = vadd.f32 %v519_v23, %v444_v10  ;;  %v362_v25 = vpop.f32.mrb[3].mxu1 }
 0x1c3   :  { %410 = vst [vmem:[%s709_s5 + $0x20] sm:$0xff] %v360_v22  ;;  %v363_v26 = vadd.f32 %v444_v10, %v362_v25 }
 0x1c4   :  { %413 = vst [vmem:[%s709_s5 + $0x38] sm:$0xff] %v371_v24 }
 0x1c5   :  { %411 = vst [vmem:[%s709_s5 + $0x28] sm:$0xff] %v363_v26 }
 0x1c7   :  { %v522_v27 = vpop.f32.mrb[4].mxu1 }
 0x1c8   :  { %v384_v28 = vadd.f32 %v522_v27, %v444_v10  ;;  %v375_v29 = vpop.f32.mrb[5].mxu1 }
 0x1c9   :  { %v376_v30 = vadd.f32 %v444_v10, %v375_v29  ;;  %v523_v31 = vpop.f32.mrb[6].mxu1 }
 0x1ca   :  { %416 = vst [vmem:[%s709_s5 + $0x50] sm:$0xff] %v384_v28  ;;  %v387_v32 = vadd.f32 %v523_v31, %v444_v10  ;;  %v378_v33 = vpop.f32.mrb[7].mxu1 }
 0x1cb   :  { %414 = vst [vmem:[%s709_s5 + $0x40] sm:$0xff] %v376_v30  ;;  %v379_v34 = vadd.f32 %v444_v10, %v378_v33 }
 0x1cc   :  { %417 = vst [vmem:[%s709_s5 + $0x58] sm:$0xff] %v387_v32 }
 0x1cd   :  { %415 = vst [vmem:[%s709_s5 + $0x48] sm:$0xff] %v379_v34 }
 0x1cf   :  { %v526_v35 = vpop.f32.mrb[8].mxu1 }
 0x1d0   :  { %v400_v36 = vadd.f32 %v526_v35, %v444_v10  ;;  %v391_v37 = vpop.f32.mrb[9].mxu1 }
 0x1d1   :  { %v392_v38 = vadd.f32 %v444_v10, %v391_v37  ;;  %v527_v39 = vpop.f32.mrb[10].mxu1 }
 0x1d2   :  { %420 = vst [vmem:[%s709_s5 + $0x70] sm:$0xff] %v400_v36  ;;  %v403_v40 = vadd.f32 %v527_v39, %v444_v10  ;;  %v394_v41 = vpop.f32.mrb[11].mxu1 }
 0x1d3   :  { %418 = vst [vmem:[%s709_s5 + $0x60] sm:$0xff] %v392_v38  ;;  %v395_v42 = vadd.f32 %v444_v10, %v394_v41 }
 0x1d4   :  { %421 = vst [vmem:[%s709_s5 + $0x78] sm:$0xff] %v403_v40 }
 0x1d5   :  { %419 = vst [vmem:[%s709_s5 + $0x68] sm:$0xff] %v395_v42 }

</bundles_post_ra>
